<compile_context>
chip_gen: v7x
topology: tpu7x:2x2x1
jax: 0.10.0
libtpu: 0.0.40
codegen_flags: <defaults>
</compile_context>

<pallas_src>
import functools

import jax
import jax.numpy as jnp
import numpy as np
from jax.experimental import pallas as pl
from jax.experimental.pallas import tpu as pltpu

EPS = 1e-5  # nn.BatchNorm2d default


# ---------------------------------------------------------------------------
# Parameter preparation (wrapper side, plain XLA): BN folding + Toeplitz
# conv matrices so the kernel is pure "matmul + elementwise".
# ---------------------------------------------------------------------------
def fold_bn(gamma, beta, mean, var):
    scale = gamma / jnp.sqrt(var + EPS)
    return scale, beta - mean * scale


def conv_toeplitz(w_hwio, width, pad):
    """(KH,KW,Ci,Co) -> (KH, width*Ci, width*Co) width-Toeplitz matrices.

    T[kh][wi*Ci+ci, wo*Co+co] = w[kh, kw, ci, co] with wi = wo + kw - pad;
    out-of-range wi has no entry, i.e. zero padding along W is baked in.
    """
    KH, KW, Ci, Co = w_hwio.shape
    mats = []
    for kh in range(KH):
        t = jnp.zeros((width * Ci, width * Co), jnp.float32)
        for kw in range(KW):
            shift = jnp.eye(width, k=pad - kw, dtype=jnp.float32)
            t = t + jnp.kron(shift, w_hwio[kh, kw].astype(jnp.float32))
        mats.append(t)
    return jnp.stack(mats)


def prepare_params(p, H, W, Cin, Cout):
    WC = W * Cout
    WCp = ((WC + 127) // 128) * 128          # lane-pad folded axis to 128 mult
    lpad = WCp - WC

    s1, b1 = fold_bn(p["g1"], p["b1"], p["m1"], p["v1"])
    s2, b2 = fold_bn(p["g2"], p["b2"], p["m2"], p["v2"])

    # conv1 (5x5): BN1 scale folded into the weights.
    t1 = conv_toeplitz(p["w1"] * s1[None, None, None, :], W, 2)  # (5, W*Cin, WC)

    # conv0 shortcut: raw 3x3 conv, or a delta kernel for nn.Identity.
    w0 = p.get("w0")
    if w0 is None:  # Cin == Cout, stride == 1 -> nn.Identity (bf16-exact copy)
        w0 = jnp.eye(Cin, Cout, dtype=jnp.float32)[None, None]
    ph, pw = (5 - w0.shape[0]) // 2, (5 - w0.shape[1]) // 2
    t0 = conv_toeplitz(jnp.pad(w0, ((ph, ph), (pw, pw), (0, 0), (0, 0))), W, 2)

    # Lane-pad output columns, concat [conv1 | conv0], flatten the 5 H-taps
    # into the contraction dim (im2row RHS): (5*W*Cin, 2*WCp).
    t1 = jnp.pad(t1, ((0, 0), (0, 0), (0, lpad)))
    t0 = jnp.pad(t0, ((0, 0), (0, 0), (0, lpad)))
    tc = jnp.concatenate([t1, t0], axis=-1).reshape(5 * W * Cin, 2 * WCp)
    tc = tc.astype(jnp.bfloat16)

    # conv2 (3x3): BN2 scale folded; lane-padded on both activation axes.
    t2 = conv_toeplitz(p["w2"] * s2[None, None, None, :], W, 1)  # (3, WC, WC)
    t2 = jnp.pad(t2, ((0, 0), (0, lpad), (0, lpad))).astype(jnp.bfloat16)

    # Per-channel vectors tiled across W (lane-dense rows), packed in ONE tile:
    # rows = [bias1, prelu1_slope(Cout), bias2, prelu2_slope(Cout), prelu(1)].
    def lane(v):
        return jnp.pad(jnp.tile(v, W), (0, lpad))

    pvec = jnp.stack([
        lane(b1),
        lane(p["a1"]),
        lane(b2),
        lane(p["a2"]),
        jnp.pad(jnp.broadcast_to(p["arelu1"], (WC,)), (0, lpad)),
    ]).astype(jnp.float32)                                        # (5, WCp)

    # SE: global-mean + fc1 folded into one (WCp, 16) matrix; fc2 pre-tiled to
    # (16, WCp) so the gate lands directly in the lane-dense layout.
    mfc1 = jnp.pad(jnp.tile(p["wfc1"], (W, 1)) / float(H * W),
                   ((0, lpad), (0, 0))).astype(jnp.float32)
    wfc2t = jnp.pad(jnp.tile(p["wfc2"], (1, W)),
                    ((0, 0), (0, lpad))).astype(jnp.float32)
    return tc, t2, pvec, mfc1, wfc2t, WC, WCp


def _pick_batch_tile(N, H, KC1, WCp):
    """Images per grid step: target >=128 MXU rows, keep per-step VMEM modest."""
    target = max(1, -(-128 // H))
    B = max(1, min(N, target))
    est = lambda b: b * H * (2 * KC1 + 18 * WCp)   # rough bytes/step
    while B > 1 and est(B) > 24 * (1 << 20):
        B -= 1
    return B


# ---------------------------------------------------------------------------
# The fused kernel: one grid step == one batch sub-tile, everything in VMEM.
# ---------------------------------------------------------------------------
def _fused_kernel(x_ref, tc_ref, t2_ref, pv_ref, mfc1_ref, wfc2_ref, o_ref,
                  *, B, H, WCp):
    f32, bf16 = jnp.float32, jnp.bfloat16
    Hp = H + 2
    Mp = B * Hp

    # ---- conv0 (shortcut) + conv1 (BN1 scale folded): one im2row matmul -----
    # x_ref: (B*H, 5*W*Cin) bf16; tc_ref: (5*W*Cin, 2*WCp) bf16.
    acc01 = jnp.dot(x_ref[...], tc_ref[...], preferred_element_type=f32)
    h1 = acc01[:, :WCp] + pv_ref[0:1, :]            # conv1 + BN1 bias
    y = acc01[:, WCp:]                              # conv0 shortcut
    a1 = pv_ref[1:2, :]
    h1 = jnp.where(h1 >= 0, h1, a1 * h1)            # PReLU(Cout)
    h1b = h1.astype(bf16)                           # single bf16 cast

    # Per-image H halo of 1 (zero rows), flat (B*(H+2), WCp) slab in VMEM.
    zrow = jnp.zeros((1, WCp), bf16)
    pieces = []
    for b in range(B):
        pieces += [zrow, h1b[b * H:(b + 1) * H, :], zrow]
    hpad = jnp.concatenate(pieces, axis=0)          # (Mp, WCp)

    # ---- conv2 (BN2 scale folded): 3 row-shifted matmuls over the slab ------
    # (rows straddling image boundaries are junk and simply never read).
    acc2 = jnp.dot(hpad[0:Mp - 2, :], t2_ref[0], preferred_element_type=f32)
    for kh in range(1, 3):
        acc2 = acc2 + jnp.dot(hpad[kh:kh + Mp - 2, :], t2_ref[kh],
                              preferred_element_type=f32)

    b2 = pv_ref[2:3, :]
    a2 = pv_ref[3:4, :]
    nh = mfc1_ref.shape[-1]
    a_r1 = pv_ref[4:5, 0:nh]                        # PReLU(1) slope

    # ---- per-image squeeze-excite + residual + PReLU ------------------------
    zs = []
    for b in range(B):
        h2 = acc2[b * Hp:b * Hp + H, :] + b2                     # (H, WCp)
        rowsum = jnp.sum(h2, axis=0, keepdims=True)              # (1, WCp)
        hid = jnp.dot(rowsum, mfc1_ref[...], preferred_element_type=f32)
        hid = jnp.where(hid >= 0, hid, a_r1 * hid)               # PReLU(1)
        gate = jax.nn.sigmoid(jnp.dot(hid, wfc2_ref[...],
                                      preferred_element_type=f32))
        z = h2 * gate + y[b * H:(b + 1) * H, :]
        zs.append(jnp.where(z >= 0, z, a2 * z))                  # PReLU(Cout)
    o_ref[...] = jnp.concatenate(zs, axis=0).astype(o_ref.dtype)  # lane-dense


def flow_res_block(x_nhwc, p, *, out_dtype=jnp.bfloat16):
    """x_nhwc: (N, H, W, Cin) float32.  Returns (N, H, W, Cout) in out_dtype."""
    N, H, W, Cin = x_nhwc.shape
    Cout = p["w1"].shape[-1]
    tc, t2, pvec, mfc1, wfc2t, WC, WCp = prepare_params(p, H, W, Cin, Cout)

    KC1 = 5 * W * Cin
    # H-direction im2row built once in the wrapper (input is tiny next to the
    # Toeplitz weights): row h carries the 5 halo rows h..h+4 of the H-padded
    # image, so the kernel's conv0+conv1 is ONE matmul with K = 5*W*Cin.
    xh = jnp.pad(x_nhwc, ((0, 0), (2, 2), (0, 0), (0, 0))).reshape(N, H + 4, W * Cin)
    xrows = jnp.concatenate([xh[:, kh:kh + H, :] for kh in range(5)], axis=-1)
    xrows = xrows.astype(jnp.bfloat16)

    B = _pick_batch_tile(N, H, KC1, WCp)
    G = -(-N // B)
    Npad = G * B
    if Npad != N:
        xrows = jnp.pad(xrows, ((0, Npad - N), (0, 0), (0, 0)))
    lhs = xrows.reshape(Npad * H, KC1)
    M = B * H

    kernel = functools.partial(_fused_kernel, B=B, H=H, WCp=WCp)
    out = pl.pallas_call(
        kernel,
        out_shape=jax.ShapeDtypeStruct((Npad * H, WCp), out_dtype),
        grid=(G,),
        in_specs=[
            pl.BlockSpec((M, KC1), lambda g: (g, 0)),               # im2row input
            pl.BlockSpec((KC1, 2 * WCp), lambda g: (0, 0)),         # conv1|conv0 RHS
            pl.BlockSpec((3, WCp, WCp), lambda g: (0, 0, 0)),       # conv2 RHS
            pl.BlockSpec((5, WCp), lambda g: (0, 0)),               # packed params
            pl.BlockSpec((WCp, mfc1.shape[-1]), lambda g: (0, 0)),  # SE fc1 (mean folded)
            pl.BlockSpec((wfc2t.shape[0], WCp), lambda g: (0, 0)),  # SE fc2 (tiled)
        ],
        out_specs=pl.BlockSpec((M, WCp), lambda g: (g, 0)),
        compiler_params=pltpu.CompilerParams(
            dimension_semantics=("parallel",),
            vmem_limit_bytes=48 * 1024 * 1024),
    )(lhs, tc, t2, pvec, mfc1, wfc2t)

    out = out.reshape(Npad, H, WCp)[:N, :, :WC].reshape(N, H, W, Cout)
    return out


# ---------------------------------------------------------------------------
# Pure-JAX references for correctness checks.
# ---------------------------------------------------------------------------
def _conv(x, w, pad, precision=None):
    return jax.lax.conv_general_dilated(
        x, w, (1, 1), [(pad, pad), (pad, pad)],
        dimension_numbers=("NHWC", "HWIO", "NHWC"),
        precision=precision, preferred_element_type=jnp.float32)


def ref_forward(x, p, *, bf16):
    """bf16=False: faithful f32 (HIGHEST) PyTorch semantics.
    bf16=True: mirrors the kernel's numerics (BN scale folded into bf16 conv
    weights, f32 accumulation) for a tight structural check."""
    def prelu(v, a):
        return jnp.where(v >= 0, v, a * v)

    w0 = p.get("w0")
    if bf16:
        s1, b1 = fold_bn(p["g1"], p["b1"], p["m1"], p["v1"])
        s2, b2 = fold_bn(p["g2"], p["b2"], p["m2"], p["v2"])
        xb = x.astype(jnp.bfloat16)
        y = xb.astype(jnp.float32) if w0 is None else _conv(
            xb, w0.astype(jnp.bfloat16), w0.shape[0] // 2)
        h = _conv(xb, (p["w1"] * s1).astype(jnp.bfloat16), 2) + b1
        h = prelu(h, p["a1"])
        h = _conv(h.astype(jnp.bfloat16), (p["w2"] * s2).astype(jnp.bfloat16), 1) + b2
        wmean = h.mean(axis=(1, 2))
        wmean = prelu(jnp.dot(wmean, p["wfc1"]), p["arelu1"])
        gate = jax.nn.sigmoid(jnp.dot(wmean, p["wfc2"]))
    else:
        prec = jax.lax.Precision.HIGHEST

        def bn(v, g, b, m, var):
            return (v - m) / jnp.sqrt(var + EPS) * g + b

        y = x if w0 is None else _conv(x, w0, w0.shape[0] // 2, prec)
        h = prelu(bn(_conv(x, p["w1"], 2, prec),
                     p["g1"], p["b1"], p["m1"], p["v1"]), p["a1"])
        h = bn(_conv(h, p["w2"], 1, prec), p["g2"], p["b2"], p["m2"], p["v2"])
        wmean = h.mean(axis=(1, 2))
        wmean = prelu(jnp.dot(wmean, p["wfc1"], precision=prec), p["arelu1"])
        gate = jax.nn.sigmoid(jnp.dot(wmean, p["wfc2"], precision=prec))
    return prelu(h * gate[:, None, None, :] + y, p["a2"])


# ---------------------------------------------------------------------------
if __name__ == "__main__":
    N, Cin, Cout, H, W = 2, 4, 8, 16, 16
    key = jax.random.PRNGKey(0)
    ks = jax.random.split(key, 16)

    params = {
        # conv weights in HWIO layout
        "w0": jax.random.normal(ks[0], (3, 3, Cin, Cout), jnp.float32) * 0.1,
        "w1": jax.random.normal(ks[1], (5, 5, Cin, Cout), jnp.float32) * 0.1,
        "w2": jax.random.normal(ks[2], (3, 3, Cout, Cout), jnp.float32) * 0.1,
        # BatchNorm running stats / affine params (eval mode)
        "g1": jax.random.normal(ks[3], (Cout,), jnp.float32) * 0.1 + 1.0,
        "b1": jax.random.normal(ks[4], (Cout,), jnp.float32) * 0.1,
        "m1": jax.random.normal(ks[5], (Cout,), jnp.float32) * 0.1,
        "v1": jnp.abs(jax.random.normal(ks[6], (Cout,), jnp.float32)) * 0.5 + 0.5,
        "g2": jax.random.normal(ks[7], (Cout,), jnp.float32) * 0.1 + 1.0,
        "b2": jax.random.normal(ks[8], (Cout,), jnp.float32) * 0.1,
        "m2": jax.random.normal(ks[9], (Cout,), jnp.float32) * 0.1,
        "v2": jnp.abs(jax.random.normal(ks[10], (Cout,), jnp.float32)) * 0.5 + 0.5,
        # PReLU slopes
        "a1": jnp.full((Cout,), 0.25, jnp.float32),                        # conv1 PReLU(Cout)
        "arelu1": jnp.array([0.25], jnp.float32),                          # relu1 = PReLU(1)
        "a2": jax.random.uniform(ks[11], (Cout,), jnp.float32, 0.1, 0.4),  # relu2
        # fc1 / fc2 (1x1 convs) as matrices
        "wfc1": jax.random.normal(ks[12], (Cout, 16), jnp.float32) * 0.2,
        "wfc2": jax.random.normal(ks[13], (16, Cout), jnp.float32) * 0.2,
    }

    x = jax.random.normal(ks[14], (N, H, W, Cin), jnp.float32)   # NHWC

    out = jax.block_until_ready(jax.jit(flow_res_block)(x, params))
    out_f = np.asarray(out.astype(jnp.float32))

    # Tight structural check against a bf16-matched reference.
    ref_b = np.asarray(jax.block_until_ready(ref_forward(x, params, bf16=True)))
    np.testing.assert_allclose(out_f, ref_b, rtol=1e-2, atol=1e-2)
    # Loose check against the faithful f32 (PyTorch-semantics) reference.
    ref_f = np.asarray(jax.block_until_ready(ref_forward(x, params, bf16=False)))
    np.testing.assert_allclose(out_f, ref_f, rtol=6e-2, atol=6e-2)

    print("KERNEL_OK")
</pallas_src>

<mosaic_0001>
module attributes {stable_mosaic.version = 11 : i64} {
  func.func @_fused_kernel(%arg0: i32, %arg1: memref<32x320xbf16, #tpu.memory_space<vmem>>, %arg2: memref<320x256xbf16, #tpu.memory_space<vmem>>, %arg3: memref<3x128x128xbf16, #tpu.memory_space<vmem>>, %arg4: memref<5x128xf32, #tpu.memory_space<vmem>>, %arg5: memref<128x16xf32, #tpu.memory_space<vmem>>, %arg6: memref<16x128xf32, #tpu.memory_space<vmem>>, %arg7: memref<32x128xbf16, #tpu.memory_space<vmem>>) attributes {dimension_semantics = [#tpu.dimension_semantics<parallel>], iteration_bounds = array<i64: 1>, scalar_prefetch = 0 : i64, scratch_operands = 0 : i64, tpu.core_type = #tpu.core_type<tc>, window_params = [{transform_indices = @transform_0, window_bounds = array<i64: 32, 320>}, {pipeline_mode = #tpu.pipeline_mode<synchronous>, transform_indices = @transform_1, window_bounds = array<i64: 320, 256>}, {pipeline_mode = #tpu.pipeline_mode<synchronous>, transform_indices = @transform_2, window_bounds = array<i64: 3, 128, 128>}, {pipeline_mode = #tpu.pipeline_mode<synchronous>, transform_indices = @transform_3, window_bounds = array<i64: 5, 128>}, {pipeline_mode = #tpu.pipeline_mode<synchronous>, transform_indices = @transform_4, window_bounds = array<i64: 128, 16>}, {pipeline_mode = #tpu.pipeline_mode<synchronous>, transform_indices = @transform_5, window_bounds = array<i64: 16, 128>}, {transform_indices = @transform_6, window_bounds = array<i64: 32, 128>}]} {
    %c0 = arith.constant 0 : index
    %c0_0 = arith.constant 0 : index
    %0 = vector.load %arg1[%c0, %c0_0] : memref<32x320xbf16, #tpu.memory_space<vmem>>, vector<32x320xbf16>
    %c0_1 = arith.constant 0 : index
    %c0_2 = arith.constant 0 : index
    %1 = vector.load %arg2[%c0_1, %c0_2] : memref<320x256xbf16, #tpu.memory_space<vmem>>, vector<320x256xbf16>
    %cst = arith.constant dense<0.000000e+00> : vector<32x256xf32>
    %2 = tpu.matmul %0, %1, %cst {dimension_numbers = #tpu.dot_dimension_numbers<[1], [0], [0], [1], [0, 0, 1, 1], [], []>} : vector<32x320xbf16>, vector<320x256xbf16>, vector<32x256xf32> -> vector<32x256xf32>
    %3 = vector.extract_strided_slice %2 {offsets = [0, 0], sizes = [32, 128], strides = [1, 1]} : vector<32x256xf32> to vector<32x128xf32>
    %c0_3 = arith.constant 0 : index
    %c0_4 = arith.constant 0 : index
    %4 = vector.load %arg4[%c0_3, %c0_4] : memref<5x128xf32, #tpu.memory_space<vmem>>, vector<1x128xf32>
    %5 = vector.broadcast %4 : vector<1x128xf32> to vector<32x128xf32>
    %6 = arith.addf %3, %5 : vector<32x128xf32>
    %7 = vector.extract_strided_slice %2 {offsets = [0, 128], sizes = [32, 128], strides = [1, 1]} : vector<32x256xf32> to vector<32x128xf32>
    %c1 = arith.constant 1 : index
    %c0_5 = arith.constant 0 : index
    %8 = vector.load %arg4[%c1, %c0_5] : memref<5x128xf32, #tpu.memory_space<vmem>>, vector<1x128xf32>
    %cst_6 = arith.constant 0.000000e+00 : f32
    %9 = vector.broadcast %cst_6 : f32 to vector<32x128xf32>
    %10 = arith.cmpf oge, %6, %9 : vector<32x128xf32>
    %11 = vector.broadcast %8 : vector<1x128xf32> to vector<32x128xf32>
    %12 = arith.mulf %11, %6 : vector<32x128xf32>
    %13 = arith.select %10, %6, %12 : vector<32x128xi1>, vector<32x128xf32>
    %14 = arith.truncf %13 : vector<32x128xf32> to vector<32x128xbf16>
    %cst_7 = arith.constant 0.000000e+00 : bf16
    %15 = vector.broadcast %cst_7 : bf16 to vector<1x128xbf16>
    %16 = vector.extract_strided_slice %14 {offsets = [0, 0], sizes = [16, 128], strides = [1, 1]} : vector<32x128xbf16> to vector<16x128xbf16>
    %17 = vector.extract_strided_slice %14 {offsets = [16, 0], sizes = [16, 128], strides = [1, 1]} : vector<32x128xbf16> to vector<16x128xbf16>
    %18 = tpu.concatenate %15, %16, %15, %15, %17, %15 in 0 : vector<1x128xbf16>, vector<16x128xbf16>, vector<1x128xbf16>, vector<1x128xbf16>, vector<16x128xbf16>, vector<1x128xbf16> -> vector<36x128xbf16>
    %19 = vector.extract_strided_slice %18 {offsets = [0, 0], sizes = [34, 128], strides = [1, 1]} : vector<36x128xbf16> to vector<34x128xbf16>
    %c0_8 = arith.constant 0 : index
    %c0_9 = arith.constant 0 : index
    %c0_10 = arith.constant 0 : index
    %20 = vector.load %arg3[%c0_8, %c0_9, %c0_10] : memref<3x128x128xbf16, #tpu.memory_space<vmem>>, vector<1x128x128xbf16>
    %21 = vector.shape_cast %20 : vector<1x128x128xbf16> to vector<128x128xbf16>
    %cst_11 = arith.constant dense<0.000000e+00> : vector<34x128xf32>
    %22 = tpu.matmul %19, %21, %cst_11 {dimension_numbers = #tpu.dot_dimension_numbers<[1], [0], [0], [1], [0, 0, 1, 1], [], []>} : vector<34x128xbf16>, vector<128x128xbf16>, vector<34x128xf32> -> vector<34x128xf32>
    %23 = vector.extract_strided_slice %18 {offsets = [1, 0], sizes = [34, 128], strides = [1, 1]} : vector<36x128xbf16> to vector<34x128xbf16>
    %c1_12 = arith.constant 1 : index
    %c0_13 = arith.constant 0 : index
    %c0_14 = arith.constant 0 : index
    %24 = vector.load %arg3[%c1_12, %c0_13, %c0_14] : memref<3x128x128xbf16, #tpu.memory_space<vmem>>, vector<1x128x128xbf16>
    %25 = vector.shape_cast %24 : vector<1x128x128xbf16> to vector<128x128xbf16>
    %cst_15 = arith.constant dense<0.000000e+00> : vector<34x128xf32>
    %26 = tpu.matmul %23, %25, %cst_15 {dimension_numbers = #tpu.dot_dimension_numbers<[1], [0], [0], [1], [0, 0, 1, 1], [], []>} : vector<34x128xbf16>, vector<128x128xbf16>, vector<34x128xf32> -> vector<34x128xf32>
    %27 = arith.addf %22, %26 : vector<34x128xf32>
    %28 = vector.extract_strided_slice %18 {offsets = [2, 0], sizes = [34, 128], strides = [1, 1]} : vector<36x128xbf16> to vector<34x128xbf16>
    %c2 = arith.constant 2 : index
    %c0_16 = arith.constant 0 : index
    %c0_17 = arith.constant 0 : index
    %29 = vector.load %arg3[%c2, %c0_16, %c0_17] : memref<3x128x128xbf16, #tpu.memory_space<vmem>>, vector<1x128x128xbf16>
    %30 = vector.shape_cast %29 : vector<1x128x128xbf16> to vector<128x128xbf16>
    %cst_18 = arith.constant dense<0.000000e+00> : vector<34x128xf32>
    %31 = tpu.matmul %28, %30, %cst_18 {dimension_numbers = #tpu.dot_dimension_numbers<[1], [0], [0], [1], [0, 0, 1, 1], [], []>} : vector<34x128xbf16>, vector<128x128xbf16>, vector<34x128xf32> -> vector<34x128xf32>
    %32 = arith.addf %27, %31 : vector<34x128xf32>
    %c2_19 = arith.constant 2 : index
    %c0_20 = arith.constant 0 : index
    %33 = vector.load %arg4[%c2_19, %c0_20] : memref<5x128xf32, #tpu.memory_space<vmem>>, vector<1x128xf32>
    %c3 = arith.constant 3 : index
    %c0_21 = arith.constant 0 : index
    %34 = vector.load %arg4[%c3, %c0_21] : memref<5x128xf32, #tpu.memory_space<vmem>>, vector<1x128xf32>
    %c4 = arith.constant 4 : index
    %c0_22 = arith.constant 0 : index
    %35 = vector.load %arg4[%c4, %c0_22] : memref<5x128xf32, #tpu.memory_space<vmem>>, vector<1x16xf32>
    %36 = vector.extract_strided_slice %32 {offsets = [0, 0], sizes = [16, 128], strides = [1, 1]} : vector<34x128xf32> to vector<16x128xf32>
    %37 = vector.broadcast %33 : vector<1x128xf32> to vector<16x128xf32>
    %38 = arith.addf %36, %37 : vector<16x128xf32>
    %cst_23 = arith.constant dense<0.000000e+00> : vector<128xf32>
    %39 = vector.multi_reduction <add>, %38, %cst_23 [0] : vector<16x128xf32> to vector<128xf32>
    %40 = vector.shape_cast %39 : vector<128xf32> to vector<1x128xf32>
    %c0_24 = arith.constant 0 : index
    %c0_25 = arith.constant 0 : index
    %41 = vector.load %arg5[%c0_24, %c0_25] : memref<128x16xf32, #tpu.memory_space<vmem>>, vector<128x16xf32>
    %cst_26 = arith.constant dense<0.000000e+00> : vector<1x16xf32>
    %42 = tpu.matmul %40, %41, %cst_26 {dimension_numbers = #tpu.dot_dimension_numbers<[1], [0], [0], [1], [0, 0, 1, 1], [], []>} : vector<1x128xf32>, vector<128x16xf32>, vector<1x16xf32> -> vector<1x16xf32>
    %cst_27 = arith.constant 0.000000e+00 : f32
    %43 = vector.broadcast %cst_27 : f32 to vector<1x16xf32>
    %44 = arith.cmpf oge, %42, %43 : vector<1x16xf32>
    %45 = arith.mulf %35, %42 : vector<1x16xf32>
    %46 = arith.select %44, %42, %45 : vector<1x16xi1>, vector<1x16xf32>
    %c0_28 = arith.constant 0 : index
    %c0_29 = arith.constant 0 : index
    %47 = vector.load %arg6[%c0_28, %c0_29] : memref<16x128xf32, #tpu.memory_space<vmem>>, vector<16x128xf32>
    %cst_30 = arith.constant dense<0.000000e+00> : vector<1x128xf32>
    %48 = tpu.matmul %46, %47, %cst_30 {dimension_numbers = #tpu.dot_dimension_numbers<[1], [0], [0], [1], [0, 0, 1, 1], [], []>} : vector<1x16xf32>, vector<16x128xf32>, vector<1x128xf32> -> vector<1x128xf32>
    %49 = arith.negf %48 : vector<1x128xf32>
    %50 = math.exp %49 : vector<1x128xf32>
    %cst_31 = arith.constant 1.000000e+00 : f32
    %51 = vector.broadcast %cst_31 : f32 to vector<1x128xf32>
    %52 = arith.addf %51, %50 : vector<1x128xf32>
    %53 = arith.divf %51, %52 : vector<1x128xf32>
    %54 = vector.broadcast %53 : vector<1x128xf32> to vector<16x128xf32>
    %55 = arith.mulf %38, %54 : vector<16x128xf32>
    %56 = vector.extract_strided_slice %7 {offsets = [0, 0], sizes = [16, 128], strides = [1, 1]} : vector<32x128xf32> to vector<16x128xf32>
    %57 = arith.addf %55, %56 : vector<16x128xf32>
    %cst_32 = arith.constant 0.000000e+00 : f32
    %58 = vector.broadcast %cst_32 : f32 to vector<16x128xf32>
    %59 = arith.cmpf oge, %57, %58 : vector<16x128xf32>
    %60 = vector.broadcast %34 : vector<1x128xf32> to vector<16x128xf32>
    %61 = arith.mulf %60, %57 : vector<16x128xf32>
    %62 = arith.select %59, %57, %61 : vector<16x128xi1>, vector<16x128xf32>
    %63 = vector.extract_strided_slice %32 {offsets = [18, 0], sizes = [16, 128], strides = [1, 1]} : vector<34x128xf32> to vector<16x128xf32>
    %64 = vector.broadcast %33 : vector<1x128xf32> to vector<16x128xf32>
    %65 = arith.addf %63, %64 : vector<16x128xf32>
    %cst_33 = arith.constant dense<0.000000e+00> : vector<128xf32>
    %66 = vector.multi_reduction <add>, %65, %cst_33 [0] : vector<16x128xf32> to vector<128xf32>
    %67 = vector.shape_cast %66 : vector<128xf32> to vector<1x128xf32>
    %c0_34 = arith.constant 0 : index
    %c0_35 = arith.constant 0 : index
    %68 = vector.load %arg5[%c0_34, %c0_35] : memref<128x16xf32, #tpu.memory_space<vmem>>, vector<128x16xf32>
    %cst_36 = arith.constant dense<0.000000e+00> : vector<1x16xf32>
    %69 = tpu.matmul %67, %68, %cst_36 {dimension_numbers = #tpu.dot_dimension_numbers<[1], [0], [0], [1], [0, 0, 1, 1], [], []>} : vector<1x128xf32>, vector<128x16xf32>, vector<1x16xf32> -> vector<1x16xf32>
    %cst_37 = arith.constant 0.000000e+00 : f32
    %70 = vector.broadcast %cst_37 : f32 to vector<1x16xf32>
    %71 = arith.cmpf oge, %69, %70 : vector<1x16xf32>
    %72 = arith.mulf %35, %69 : vector<1x16xf32>
    %73 = arith.select %71, %69, %72 : vector<1x16xi1>, vector<1x16xf32>
    %c0_38 = arith.constant 0 : index
    %c0_39 = arith.constant 0 : index
    %74 = vector.load %arg6[%c0_38, %c0_39] : memref<16x128xf32, #tpu.memory_space<vmem>>, vector<16x128xf32>
    %cst_40 = arith.constant dense<0.000000e+00> : vector<1x128xf32>
    %75 = tpu.matmul %73, %74, %cst_40 {dimension_numbers = #tpu.dot_dimension_numbers<[1], [0], [0], [1], [0, 0, 1, 1], [], []>} : vector<1x16xf32>, vector<16x128xf32>, vector<1x128xf32> -> vector<1x128xf32>
    %76 = arith.negf %75 : vector<1x128xf32>
    %77 = math.exp %76 : vector<1x128xf32>
    %cst_41 = arith.constant 1.000000e+00 : f32
    %78 = vector.broadcast %cst_41 : f32 to vector<1x128xf32>
    %79 = arith.addf %78, %77 : vector<1x128xf32>
    %80 = arith.divf %78, %79 : vector<1x128xf32>
    %81 = vector.broadcast %80 : vector<1x128xf32> to vector<16x128xf32>
    %82 = arith.mulf %65, %81 : vector<16x128xf32>
    %83 = vector.extract_strided_slice %7 {offsets = [16, 0], sizes = [16, 128], strides = [1, 1]} : vector<32x128xf32> to vector<16x128xf32>
    %84 = arith.addf %82, %83 : vector<16x128xf32>
    %cst_42 = arith.constant 0.000000e+00 : f32
    %85 = vector.broadcast %cst_42 : f32 to vector<16x128xf32>
    %86 = arith.cmpf oge, %84, %85 : vector<16x128xf32>
    %87 = vector.broadcast %34 : vector<1x128xf32> to vector<16x128xf32>
    %88 = arith.mulf %87, %84 : vector<16x128xf32>
    %89 = arith.select %86, %84, %88 : vector<16x128xi1>, vector<16x128xf32>
    %90 = tpu.concatenate %62, %89 in 0 : vector<16x128xf32>, vector<16x128xf32> -> vector<32x128xf32>
    %91 = arith.truncf %90 : vector<32x128xf32> to vector<32x128xbf16>
    %c0_43 = arith.constant 0 : index
    %c0_44 = arith.constant 0 : index
    %92 = vector.load %arg7[%c0_43, %c0_44] : memref<32x128xbf16, #tpu.memory_space<vmem>>, vector<32x128xbf16>
    tpu.vector_store %arg7[%c0_43, %c0_44], %91 {strides = array<i32>} : memref<32x128xbf16, #tpu.memory_space<vmem>>, vector<32x128xbf16>,
    return
  }
  func.func @transform_0(%arg0: i32) -> (i32, i32) {
    %c0_i32 = arith.constant 0 : i32
    %c0_i32_0 = arith.constant 0 : i32
    return %arg0, %c0_i32 : i32, i32
  }
  func.func @transform_1(%arg0: i32) -> (i32, i32) {
    %c0_i32 = arith.constant 0 : i32
    %c0_i32_0 = arith.constant 0 : i32
    %c0_i32_1 = arith.constant 0 : i32
    return %c0_i32, %c0_i32_0 : i32, i32
  }
  func.func @transform_2(%arg0: i32) -> (i32, i32, i32) {
    %c0_i32 = arith.constant 0 : i32
    %c0_i32_0 = arith.constant 0 : i32
    %c0_i32_1 = arith.constant 0 : i32
    %c0_i32_2 = arith.constant 0 : i32
    return %c0_i32, %c0_i32_0, %c0_i32_1 : i32, i32, i32
  }
  func.func @transform_3(%arg0: i32) -> (i32, i32) {
    %c0_i32 = arith.constant 0 : i32
    %c0_i32_0 = arith.constant 0 : i32
    %c0_i32_1 = arith.constant 0 : i32
    return %c0_i32, %c0_i32_0 : i32, i32
  }
  func.func @transform_4(%arg0: i32) -> (i32, i32) {
    %c0_i32 = arith.constant 0 : i32
    %c0_i32_0 = arith.constant 0 : i32
    %c0_i32_1 = arith.constant 0 : i32
    return %c0_i32, %c0_i32_0 : i32, i32
  }
  func.func @transform_5(%arg0: i32) -> (i32, i32) {
    %c0_i32 = arith.constant 0 : i32
    %c0_i32_0 = arith.constant 0 : i32
    %c0_i32_1 = arith.constant 0 : i32
    return %c0_i32, %c0_i32_0 : i32, i32
  }
  func.func @transform_6(%arg0: i32) -> (i32, i32) {
    %c0_i32 = arith.constant 0 : i32
    %c0_i32_0 = arith.constant 0 : i32
    return %arg0, %c0_i32 : i32, i32
  }
}

</mosaic_0001>

<bundles_post_ra>
// kernel: tile.33
= control target key start
LH: loop header
LB: loop body
LE: loop exit
PB: predicated region body
PF: predicated region fallthrough
CT: control target
= control target key end

     0   :  { %s28_s0 = inlined_call_operand.vmem [shape: f32[8], index: 0, kind: input, shape index: {}]   ;;  %s29_s1 = inlined_call_operand.vmem [shape: f32[16,8], index: 1, kind: output, shape index: {}]  }
   0x1   :  { %v4_v0 = vld [vmem:[%s28_s0] ss:$0 sm:$0xff] }
   0x2   :  { %5 = vst [vmem:[%s29_s1] sm:$0xff] %v4_v0  ;;  %8 = vst [vmem:[%s29_s1 + $0x8] sm:$0xff] %v4_v0 }

// kernel: flow_res_block.1
= control target key start
LH: loop header
LB: loop body
LE: loop exit
PB: predicated region body
PF: predicated region fallthrough
CT: control target
= control target key end

     0   :  { %v1860_v1 = vmov 0.0   ;;  %v1861_v46 = vmov 0   ;;  %vm302_vm0 = vcmask 523264   ;;  %vm1862_vm1 = vmmov 0   ;;  %s2328_s1 = inlined_call_operand.vmem [shape: bf16[320,256], index: 1, kind: input, shape index: {}]   ;;  %s2329_s0 = inlined_call_operand.vmem [shape: bf16[32,320], index: 0, kind: input, shape index: {}]   ;;  %s2330_s2 = inlined_call_operand.vmem [shape: bf16[3,128,128], index: 2, kind: input, shape index: {}]   ;;  %s2331_s3 = inlined_call_operand.vmem [shape: f32[5,128], index: 3, kind: input, shape index: {}]   ;;  %s2332_s4 = inlined_call_operand.vmem [shape: f32[128,16], index: 4, kind: input, shape index: {}]   ;;  %s2333_s5 = inlined_call_operand.vmem [shape: f32[16,128], index: 5, kind: input, shape index: {}]   ;;  %s2334_s6 = inlined_call_operand.vmem [shape: bf16[32,128], index: 6, kind: output, shape index: {}]  }
   0x1   :  { %v1760_v0 = vld [vmem:[%s2328_s1 + $0x4] ss:$8 sps:$4 sm:$0xff]   ;;  %1526 = vmatprep.subr.bf16.mxu1 %v1860_v1  ;;  %v1762_v2 = vld [vmem:[%s2328_s1] ss:$8 sps:$4 sm:$0xff]   ;;  %v1763_v3 = vld [vmem:[%s2328_s1 + $0x14] ss:$8 sps:$4 sm:$0xff]   ;;  %1542 = vmatprep.mubr.msk.bf16.mxu1 %vm1862_vm1, %v1860_v1 }
   0x2   :  { %309 = vmatprep.subr.bf16.mxu0 %v1760_v0  ;;  %v1765_v4 = vld [vmem:[%s2328_s1 + $0x10] ss:$8 sps:$4 sm:$0xff]   ;;  %v1766_v5 = vld [vmem:[%s2328_s1 + $0x24] ss:$8 sps:$4 sm:$0xff]   ;;  %v1768_v6 = vld [vmem:[%s2328_s1 + $0x20] ss:$8 sps:$4 sm:$0xff]  }
   0x3   :  { %310 = vmatpush1.bf16.msra.mxu0 %v1762_v2  ;;  %v1769_v7 = vld [vmem:[%s2328_s1 + $0x34] ss:$8 sps:$4 sm:$0xff]   ;;  %v1771_v8 = vld [vmem:[%s2328_s1 + $0x30] ss:$8 sps:$4 sm:$0xff]   ;;  %v1772_v9 = vld [vmem:[%s2328_s1 + $0x44] ss:$8 sps:$4 sm:$0xff]  }
   0x4   :  { %311 = vmatprep.subr.bf16.mxu0 %v1763_v3  ;;  %v1774_v10 = vld [vmem:[%s2328_s1 + $0x40] ss:$8 sps:$4 sm:$0xff]   ;;  %v1775_v11 = vld [vmem:[%s2328_s1 + $0x54] ss:$8 sps:$4 sm:$0xff]   ;;  %v1777_v12 = vld [vmem:[%s2328_s1 + $0x50] ss:$8 sps:$4 sm:$0xff]  }
   0x5   :  { %v1778_v13 = vld [vmem:[%s2328_s1 + $0x64] ss:$8 sps:$4 sm:$0xff]   ;;  %v1780_v15 = vld [vmem:[%s2328_s1 + $0x60] ss:$8 sps:$4 sm:$0xff]   ;;  %v1781_v16 = vld [vmem:[%s2328_s1 + $0x74] ss:$8 sps:$4 sm:$0xff]  }
   0x6   :  { %v1810_v14 = vld [vmem:[%s2329_s0 + $0x4] ss:$12 sps:$4 sm:$0xff]   ;;  %v1786_v19 = vld [vmem:[%s2328_s1 + $0x80] ss:$8 sps:$4 sm:$0xff]   ;;  %v1787_v20 = vld [vmem:[%s2328_s1 + $0x94] ss:$8 sps:$4 sm:$0xff]  }
   0x7   :  { %312 = vmatpush1.bf16.msra.mxu0 %v1765_v4  ;;  %341 = vmatprep.mubr.bf16.mxu0 %v1810_v14  ;;  %v1783_v17 = vld [vmem:[%s2328_s1 + $0x70] ss:$8 sps:$4 sm:$0xff]   ;;  %v1784_v18 = vld [vmem:[%s2328_s1 + $0x84] ss:$8 sps:$4 sm:$0xff]   ;;  %v1792_v24 = vld [vmem:[%s2328_s1 + $0xa0] ss:$8 sps:$4 sm:$0xff]  }
   0x8   :  { %313 = vmatprep.subr.bf16.mxu0 %v1766_v5  ;;  %v1828_v21 = vld [vmem:[%s2330_s2 + $0x40] sm:$0xff]   ;;  %v1789_v22 = vld [vmem:[%s2328_s1 + $0x90] ss:$8 sps:$4 sm:$0xff]   ;;  %v1793_v25 = vld [vmem:[%s2328_s1 + $0xb4] ss:$8 sps:$4 sm:$0xff]   ;;  %vm461_vm4 = vcmask 1040384  }
   0x9   :  { %v1790_v23 = vld [vmem:[%s2328_s1 + $0xa4] ss:$8 sps:$4 sm:$0xff]   ;;  %1527 = vmatpush3.bf16.msra.mxu1 %v1828_v21  ;;  %v1795_v26 = vld [vmem:[%s2328_s1 + $0xb0] ss:$8 sps:$4 sm:$0xff]   ;;  %v1798_v28 = vld [vmem:[%s2328_s1 + $0xc0] ss:$8 sps:$4 sm:$0xff]  }
   0xa   :  { %1528 = vmatprep.subr.bf16.mxu1 %v1860_v1  ;;  %v1796_v27 = vld [vmem:[%s2328_s1 + $0xc4] ss:$8 sps:$4 sm:$0xff]   ;;  %v1799_v29 = vld [vmem:[%s2328_s1 + $0xd4] ss:$8 sps:$4 sm:$0xff]   ;;  %v1801_v30 = vld [vmem:[%s2328_s1 + $0xd0] ss:$8 sps:$4 sm:$0xff]  }
   0xb   :  { %314 = vmatpush1.bf16.msra.mxu0 %v1768_v6  ;;  %v1802_v31 = vld [vmem:[%s2328_s1 + $0xe4] ss:$8 sps:$4 sm:$0xff]   ;;  %v1804_v32 = vld [vmem:[%s2328_s1 + $0xe0] ss:$8 sps:$4 sm:$0xff]   ;;  %v1805_v33 = vld [vmem:[%s2328_s1 + $0xf4] ss:$8 sps:$4 sm:$0xff]  }
   0xc   :  { %315 = vmatprep.subr.bf16.mxu0 %v1769_v7  ;;  %v1807_v34 = vld [vmem:[%s2328_s1 + $0xf0] ss:$8 sps:$4 sm:$0xff]   ;;  %v1813_v35 = vld [vmem:[%s2328_s1 + $0x104] ss:$8 sps:$4 sm:$0xff]   ;;  %v1811_v37 = vld [vmem:[%s2328_s1 + $0x100] ss:$8 sps:$4 sm:$0xff]  }
   0xd   :  { %v1808_v36 = vld [vmem:[%s2329_s0] ss:$12 sps:$4 sm:$0xff]   ;;  %v1817_v38 = vld [vmem:[%s2329_s0 + $0x1c] ss:$12 sps:$4 sm:$0xff]   ;;  %v1814_v40 = vld [vmem:[%s2328_s1 + $0x110] ss:$8 sps:$4 sm:$0xff]  }
   0xe   :  { %v1816_v39 = vld [vmem:[%s2328_s1 + $0x114] ss:$8 sps:$4 sm:$0xff]   ;;  %v1822_v41 = vld [vmem:[%s2328_s1 + $0x124] ss:$8 sps:$4 sm:$0xff]   ;;  %v1820_v43 = vld [vmem:[%s2328_s1 + $0x120] ss:$8 sps:$4 sm:$0xff]  }
   0xf   :  { %316 = vmatpush1.bf16.msra.mxu0 %v1771_v8  ;;  %v1819_v42 = vld [vmem:[%s2329_s0 + $0x18] ss:$12 sps:$4 sm:$0xff]   ;;  %v1825_v44 = vld [vmem:[%s2328_s1 + $0x134] ss:$8 sps:$4 sm:$0xff]   ;;  %v1827_v48 = vld [vmem:[%s2329_s0 + $0x20] ss:$12 sps:$4 sm:$0xff]  }
  0x10   :  { %317 = vmatprep.subr.bf16.mxu0 %v1772_v9  ;;  %v1823_v45 = vld [vmem:[%s2328_s1 + $0x130] ss:$8 sps:$4 sm:$0xff]   ;;  %v1826_v47 = vld [vmem:[%s2329_s0 + $0x8] ss:$12 sps:$4 sm:$0xff]   ;;  %v1832_v52 = vld [vmem:[%s2330_s2 + $0x60] sm:$0xff]   ;;  %vm471_vm6 = vcmask 1041408  }
  0x11   :  { %v1829_v49 = vld [vmem:[%s2330_s2 + $0x48] sm:$0xff]   ;;  %v1830_v50 = vld [vmem:[%s2330_s2 + $0x50] sm:$0xff]   ;;  %v1831_v51 = vld [vmem:[%s2330_s2 + $0x58] sm:$0xff]   ;;  %vm462_vm5 = vsmask.f32 256  ;;  %vm764_vm12 = vcmask 1046528  }
  0x12   :  { %1529 = vmatpush3.bf16.msra.mxu1 %v1829_v49  ;;  %v1833_v53 = vld [vmem:[%s2330_s2 + $0x68] sm:$0xff]   ;;  %v1834_v54 = vld [vmem:[%s2330_s2 + $0x70] sm:$0xff]   ;;  %v1835_v55 = vld [vmem:[%s2330_s2 + $0x78] sm:$0xff]   ;;  %vm472_vm10 = vsmask.f32 1280  ;;  %vm1093_vm14 = vcmask 1045504  }
  0x13   :  { %318 = vmatpush1.bf16.msra.mxu0 %v1774_v10  ;;  %1530 = vmatprep.subr.bf16.mxu1 %v1860_v1  ;;  %v1370_v56 = vld [vmem:[%s2331_s3] ss:$0 sm:$0xff]  ;;  %v1371_v58 = vld [vmem:[%s2331_s3 + $0x1] ss:$0 sm:$0xff]  ;;  %vm463_vm9 = vmand %vm461_vm4, %vm462_vm5  ;;  %vm509_vm13 = vsmask.f32 7424 }
  0x14   :  { %319 = vmatprep.subr.bf16.mxu0 %v1775_v11  ;;  %vm473_vm11 = vmand %vm471_vm6, %vm472_vm10 }
  0x16   :  { %1531 = vmatpush3.bf16.msra.mxu1 %v1830_v50 }
  0x17   :  { %320 = vmatpush1.bf16.msra.mxu0 %v1777_v12  ;;  %1532 = vmatprep.subr.bf16.mxu1 %v1860_v1 }
  0x18   :  { %321 = vmatprep.subr.bf16.mxu0 %v1778_v13 }
  0x1a   :  { %1533 = vmatpush3.bf16.msra.mxu1 %v1831_v51  ;;  %v1837_v51 = vld [vmem:[%s2330_s2 + $0x8] sm:$0xff]  }
  0x1b   :  { %322 = vmatpush1.bf16.msra.mxu0 %v1780_v15  ;;  %1534 = vmatprep.subr.bf16.mxu1 %v1860_v1 }
  0x1c   :  { %323 = vmatprep.subr.bf16.mxu0 %v1781_v16 }
  0x1e   :  { %1535 = vmatpush3.bf16.msra.mxu1 %v1832_v52 }
  0x1f   :  { %324 = vmatpush1.bf16.msra.mxu0 %v1783_v17  ;;  %1536 = vmatprep.subr.bf16.mxu1 %v1860_v1 }
  0x20   :  { %325 = vmatprep.subr.bf16.mxu0 %v1784_v18 }
  0x22   :  { %1537 = vmatpush3.bf16.msra.mxu1 %v1833_v53  ;;  %v1838_v53 = vld [vmem:[%s2330_s2 + $0x10] sm:$0xff]  }
  0x23   :  { %326 = vmatpush1.bf16.msra.mxu0 %v1786_v19  ;;  %1538 = vmatprep.subr.bf16.mxu1 %v1860_v1 }
  0x24   :  { %327 = vmatprep.subr.bf16.mxu0 %v1787_v20 }
  0x26   :  { %1539 = vmatpush3.bf16.msra.mxu1 %v1834_v54  ;;  %v1839_v54 = vld [vmem:[%s2330_s2 + $0x18] sm:$0xff]  }
  0x27   :  { %328 = vmatpush1.bf16.msra.mxu0 %v1789_v22  ;;  %1540 = vmatprep.subr.bf16.mxu1 %v1860_v1 }
  0x28   :  { %329 = vmatprep.subr.bf16.mxu0 %v1790_v23 }
  0x2a   :  { %1541 = vmatpush3.bf16.msra.mxu1 %v1835_v55 }
  0x2b   :  { %330 = vmatpush1.bf16.msra.mxu0 %v1792_v24  ;;  %1554 = vmatprep.subr.bf16.mxu1 %v1860_v1 }
  0x2c   :  { %331 = vmatprep.subr.bf16.mxu0 %v1793_v25 }
  0x2f   :  { %332 = vmatpush1.bf16.msra.mxu0 %v1795_v26 }
  0x30   :  { %333 = vmatprep.subr.bf16.mxu0 %v1796_v27 }
  0x33   :  { %334 = vmatpush1.bf16.msra.mxu0 %v1798_v28 }
  0x34   :  { %335 = vmatprep.subr.bf16.mxu0 %v1799_v29 }
  0x37   :  { %336 = vmatpush1.bf16.msra.mxu0 %v1801_v30 }
  0x38   :  { %337 = vmatprep.subr.bf16.mxu0 %v1802_v31 }
  0x3b   :  { %338 = vmatpush1.bf16.msra.mxu0 %v1804_v32 }
  0x3c   :  { %339 = vmatprep.subr.bf16.mxu0 %v1805_v33 }
  0x3f   :  { %340 = vmatpush1.bf16.msra.mxu0 %v1807_v34 }
  0x40   :  { %362 = vmatprep.subr.bf16.mxu0 %v1813_v35 }
  0x42   :  { %342 = vmatmul.mubr.bf16.vlgmr.msra.gmra.mrb[0].mxu0 %v1808_v36 }
  0x43   :  { %363 = vmatpush1.bf16.msra.mxu0 %v1811_v37  ;;  %351 = vmatprep.mubr.bf16.mxu0 %v1817_v38 }
  0x44   :  { %364 = vmatprep.subr.bf16.mxu0 %v1816_v39 }
  0x47   :  { %365 = vmatpush1.bf16.msra.mxu0 %v1814_v40 }
  0x48   :  { %366 = vmatprep.subr.bf16.mxu0 %v1822_v41 }
  0x4a   :  { %352 = vmatmul.mubr.bf16.gmra.mrb[4].mxu0 %v1819_v42 }
  0x4b   :  { %367 = vmatpush1.bf16.msra.mxu0 %v1820_v43  ;;  %394 = vmatprep.mubr.bf16.mxu0 %v1861_v46 }
  0x4c   :  { %368 = vmatprep.subr.bf16.mxu0 %v1825_v44  ;;  %v1836_v44 = vld [vmem:[%s2330_s2] sm:$0xff]  }
  0x4f   :  { %369 = vmatpush1.bf16.msra.mxu0 %v1823_v45 }
  0x52   :  { %1368 = vmatmul.mubr.msk.bf16.vlgmr.msra.gmra.mrb[0].mxu0 %vm302_vm0, %v1826_v47 }
  0x53   :  { %404 = vmatprep.mubr.bf16.mxu0 %v1861_v46 }
  0x5a   :  { %1369 = vmatmul.mubr.msk.bf16.gmra.mrb[4].mxu0 %vm302_vm0, %v1827_v48  ;;  %vm989_vm0 = vcmask 130048  }
  0x5b   :  { %1642 = vmatprep.mubr.msk.f32.mxu0 %vm1862_vm1, %v1860_v1 }
 0x125   :  { %v396_v57 = vpop.f32.mrb[0].mxu0 }
 0x126   :  { %v420_v59 = vadd.f32 %v1370_v56, %v396_v57  ;;  %v2080_v60 = vpop.f32.mrb[1].mxu0 }
 0x127   :  { %v400_v61 = vpop.f32.mrb[2].mxu0 }
 0x128   :  { %v433_v62 = vmul.f32 %v1371_v58, %v420_v59  ;;  %v421_v63 = vadd.f32 %v1370_v56, %v400_v61  ;;  %v2082_v0 = vpop.f32.mrb[3].mxu0  ;;  %vm425_vm2 = vcmp.ge.f32.partialorder %v420_v59, 0.0  ;;  %v1843_v61 = vld [vmem:[%s2330_s2 + $0x38] sm:$0xff]  }
 0x12a   :  { %vm426_vm3 = vcmp.ge.f32.partialorder %v421_v63, 0.0  ;;  %v434_v2 = vmul.f32 %v1371_v58, %v421_v63  ;;  %v437_v3 = vsel %vm425_vm2, %v420_v59, %v433_v62  ;;  %v1842_v59 = vld [vmem:[%s2330_s2 + $0x30] sm:$0xff]   ;;  %v1844_v62 = vld [vmem:[%s2330_s2 + $0x80] sm:$0xff]  }
 0x12c   :  { %v438_v4 = vsel %vm426_vm3, %v421_v63, %v434_v2  ;;  %v1845_v63 = vld [vmem:[%s2330_s2 + $0x88] sm:$0xff]   ;;  %v1846_v2 = vld [vmem:[%s2330_s2 + $0x90] sm:$0xff]  }
 0x12d   :  { %v441_v5 = vpack.c.bf16 %v438_v4, %v437_v3  ;;  %v406_v6 = vpop.f32.mrb[4].mxu0  ;;  %v1847_v3 = vld [vmem:[%s2330_s2 + $0x98] sm:$0xff]   ;;  %v1848_v4 = vld [vmem:[%s2330_s2 + $0xa0] sm:$0xff]  }
 0x12e   :  { %v422_v7 = vadd.f32 %v1370_v56, %v406_v6  ;;  %v2084_v8 = vpop.f32.mrb[5].mxu0  ;;  %v1850_v6 = vld [vmem:[%s2330_s2 + $0xb0] sm:$0xff]  }
 0x12f   :  { %v444_v9 = vshrl.u32 %v441_v5, 16  ;;  %v410_v10 = vpop.f32.mrb[6].mxu0  ;;  %v447_v11 = vshll.u32 %v441_v5, 16  ;;  %v1270_v16 = vrot.slane %v2084_v8, 6  ;;  %v1849_v5 = vld [vmem:[%s2330_s2 + $0xa8] sm:$0xff]  }
 0x130   :  { %v435_v12 = vmul.f32 %v1371_v58, %v422_v7  ;;  %v423_v13 = vadd.f32 %v1370_v56, %v410_v10  ;;  %v2086_v14 = vpop.f32.mrb[7].mxu0  ;;  %vm427_vm7 = vcmp.ge.f32.partialorder %v422_v7, 0.0  ;;  %v1840_v56 = vld [vmem:[%s2330_s2 + $0x20] sm:$0xff]   ;;  %v899_v10 = vld [vmem:[%s2332_s4 + $0x8] sm:$0xff] }
 0x131   :  { %v446_v15 = vrot.slane %v444_v9, 7  ;;  %v1271_v17 = vrot.slane %v2086_v14, 6  ;;  %v898_v9 = vld [vmem:[%s2332_s4] sm:$0xff] }
 0x132   :  { %vm428_vm8 = vcmp.ge.f32.partialorder %v423_v13, 0.0  ;;  %v436_v18 = vmul.f32 %v1371_v58, %v423_v13  ;;  %v439_v21 = vsel %vm427_vm7, %v422_v7, %v435_v12  ;;  %v1841_v58 = vld [vmem:[%s2330_s2 + $0x28] sm:$0xff]   ;;  %v1851_v7 = vld [vmem:[%s2330_s2 + $0xb8] sm:$0xff]   ;;  %v1863_v12 = vmov 0.0|0.0  }
 0x133   :  { %v449_v19 = vor.u32 %v447_v11, %v446_v15  ;;  %v2095_v20 = vsel %vm471_vm6, %v1270_v16, %v1271_v17  ;;  %v465_v28 = vsel %vm463_vm9, %v446_v15, 0  ;;  %v900_v11 = vld [vmem:[%s2332_s4 + $0x10] sm:$0xff]  ;;  %1694 = vmatprep.subr.bf16.mxu0 %v1863_v12  ;;  %v901_v15 = vld [vmem:[%s2332_s4 + $0x18] sm:$0xff] }
 0x134   :  { %v440_v22 = vsel %vm428_vm8, %v423_v13, %v436_v18  ;;  %v469_v32 = vsel %vm461_vm4, %v465_v28, 0  ;;  %v1695_v13 = vpack.c.bf16 %v899_v10, %v898_v9  ;;  %v1698_v18 = vpack.c.bf16 %v901_v15, %v900_v11  ;;  %v1428_v10 = vld [vmem:[%s2331_s3 + $0x2] ss:$0 sm:$0xff] }
 0x135   :  { %v2099_v23 = vsel %vm463_vm9, 0, %v449_v19  ;;  %v442_v24 = vpack.c.bf16 %v440_v22, %v439_v21  ;;  %v902_v19 = vld [vmem:[%s2332_s4 + $0x20] sm:$0xff]  ;;  %v903_v21 = vld [vmem:[%s2332_s4 + $0x28] sm:$0xff] }
 0x136   :  { %v513_v27 = vshll.u32 %v2099_v23, 16  ;;  %v511_v36 = vshrl.u32 %v2099_v23, 16  ;;  %v765_v39 = vrot.slane %v2099_v23, 1  ;;  %1696 = vmatpush3.bf16.msra.mxu0 %v1695_v13  ;;  %v1701_v22 = vpack.c.bf16 %v903_v21, %v902_v19 }
 0x137   :  { %v453_v25 = vshrl.u32 %v442_v24, 16  ;;  %v456_v26 = vshll.u32 %v442_v24, 16  ;;  %1697 = vmatprep.subr.bf16.mxu0 %v1863_v12  ;;  %v905_v24 = vld [vmem:[%s2332_s4 + $0x38] sm:$0xff] }
 0x138   :  { %v515_v33 = vrot.slane %v513_v27, 1  ;;  %v907_v27 = vld [vmem:[%s2332_s4 + $0x48] sm:$0xff] }
 0x139   :  { %v455_v29 = vrot.slane %v453_v25, 6  ;;  %v458_v30 = vrot.slane %v456_v26, 7  ;;  %v906_v26 = vld [vmem:[%s2332_s4 + $0x40] sm:$0xff] }
 0x13a   :  { %v516_v42 = vor.u32 %v515_v33, %v511_v36  ;;  %1699 = vmatpush3.bf16.msra.mxu0 %v1698_v18  ;;  %v1707_v28 = vpack.c.bf16 %v907_v27, %v906_v26  ;;  %v911_v33 = vld [vmem:[%s2332_s4 + $0x68] sm:$0xff]  ;;  %v913_v36 = vld [vmem:[%s2332_s4 + $0x78] sm:$0xff] }
 0x13b   :  { %v459_v31 = vor.u32 %v458_v30, %v455_v29  ;;  %1700 = vmatprep.subr.bf16.mxu0 %v1863_v12  ;;  %v908_v29 = vld [vmem:[%s2332_s4 + $0x50] sm:$0xff]  ;;  %v909_v30 = vld [vmem:[%s2332_s4 + $0x58] sm:$0xff] }
 0x13d   :  { %v474_v34 = vsel %vm473_vm11, %v469_v32, %v459_v31  ;;  %v2104_v35 = vsel %vm473_vm11, %v459_v31, 0  ;;  %v1710_v31 = vpack.c.bf16 %v909_v30, %v908_v29  ;;  %v910_v32 = vld [vmem:[%s2332_s4 + $0x60] sm:$0xff] }
 0x13e   :  { %v518_v37 = vshll.u32 %v474_v34, 16  ;;  %v526_v38 = vshll.u32 %v2104_v35, 16  ;;  %v766_v40 = vrot.slane %v474_v34, 1  ;;  %v768_v41 = vrot.slane %v2104_v35, 1  ;;  %1702 = vmatpush3.bf16.msra.mxu0 %v1701_v22 }
 0x13f   :  { %v522_v45 = vshrl.u32 %v474_v34, 16  ;;  %v530_v55 = vshrl.u32 %v2104_v35, 16  ;;  %1703 = vmatprep.subr.bf16.mxu0 %v1863_v12 }
 0x140   :  { %v520_v43 = vrot.slane %v518_v37, 1  ;;  %v2113_v46 = vsel %vm764_vm12, %v765_v39, %v766_v40  ;;  %v2117_v47 = vsel %vm764_vm12, %v766_v40, %v768_v41  ;;  %v528_v50 = vrot.slane %v526_v38, 1 }
 0x142   :  { %v521_v48 = vsel %vm509_vm13, %v516_v42, %v520_v43  ;;  %v524_v49 = vor.u32 %v522_v45, %v520_v43  ;;  %v532_v57 = vor.u32 %v530_v55, %v528_v50 }
 0x143   :  { %1543 = vmatmul.mubr.bf16.vlgmr.msra.gmra.mrb[0].mxu1 %v521_v48 }
 0x144   :  { %1555 = vmatpush3.bf16.msra.mxu1 %v1836_v44  ;;  %1546 = vmatprep.mubr.msk.bf16.mxu1 %vm1862_vm1, %v1860_v1  ;;  %v529_v52 = vsel %vm509_vm13, %v524_v49, %v528_v50 }
 0x145   :  { %1556 = vmatprep.subr.bf16.mxu1 %v1860_v1 }
 0x148   :  { %1557 = vmatpush3.bf16.msra.mxu1 %v1837_v51 }
 0x149   :  { %1558 = vmatprep.subr.bf16.mxu1 %v1860_v1 }
 0x14b   :  { %1547 = vmatmul.mubr.bf16.gmra.mrb[4].mxu1 %v529_v52 }
 0x14c   :  { %1559 = vmatpush3.bf16.msra.mxu1 %v1838_v53  ;;  %1550 = vmatprep.mubr.msk.bf16.mxu1 %vm1862_vm1, %v1860_v1 }
 0x14d   :  { %1560 = vmatprep.subr.bf16.mxu1 %v1860_v1 }
 0x150   :  { %1561 = vmatpush3.bf16.msra.mxu1 %v1839_v54 }
 0x151   :  { %1562 = vmatprep.subr.bf16.mxu1 %v1860_v1 }
 0x153   :  { %1551 = vmatmul.mubr.bf16.gmra.mrb[8].mxu1 %v532_v57 }
 0x154   :  { %1563 = vmatpush3.bf16.msra.mxu1 %v1840_v56  ;;  %1570 = vmatprep.mubr.msk.bf16.mxu1 %vm1862_vm1, %v1860_v1 }
 0x155   :  { %1564 = vmatprep.subr.bf16.mxu1 %v1860_v1 }
 0x158   :  { %1565 = vmatpush3.bf16.msra.mxu1 %v1841_v58 }
 0x159   :  { %1566 = vmatprep.subr.bf16.mxu1 %v1860_v1 }
 0x15c   :  { %1567 = vmatpush3.bf16.msra.mxu1 %v1842_v59 }
 0x15d   :  { %1568 = vmatprep.subr.bf16.mxu1 %v1860_v1 }
 0x160   :  { %1569 = vmatpush3.bf16.msra.mxu1 %v1843_v61 }
 0x161   :  { %1582 = vmatprep.subr.bf16.mxu1 %v1860_v1 }
 0x163   :  { %1571 = vmatmul.mubr.bf16.vlgmr.msra.gmra.mrb[12].mxu1 %v2099_v23  ;;  %v904_v23 = vld [vmem:[%s2332_s4 + $0x30] sm:$0xff] }
 0x164   :  { %1583 = vmatpush3.bf16.msra.mxu1 %v1844_v62  ;;  %1574 = vmatprep.mubr.msk.bf16.mxu1 %vm1862_vm1, %v1860_v1  ;;  %v1704_v25 = vpack.c.bf16 %v905_v24, %v904_v23 }
 0x165   :  { %1584 = vmatprep.subr.bf16.mxu1 %v1860_v1 }
 0x166   :  { %1705 = vmatpush3.bf16.msra.mxu0 %v1704_v25 }
 0x167   :  { %1706 = vmatprep.subr.bf16.mxu0 %v1863_v12 }
 0x168   :  { %1585 = vmatpush3.bf16.msra.mxu1 %v1845_v63 }
 0x169   :  { %1586 = vmatprep.subr.bf16.mxu1 %v1860_v1 }
 0x16a   :  { %1708 = vmatpush3.bf16.msra.mxu0 %v1707_v28 }
 0x16b   :  { %1575 = vmatmul.mubr.bf16.gmra.mrb[16].mxu1 %v474_v34  ;;  %1709 = vmatprep.subr.bf16.mxu0 %v1863_v12  ;;  %v1713_v34 = vpack.c.bf16 %v911_v33, %v910_v32 }
 0x16c   :  { %1587 = vmatpush3.bf16.msra.mxu1 %v1846_v2  ;;  %1578 = vmatprep.mubr.msk.bf16.mxu1 %vm1862_vm1, %v1860_v1 }
 0x16d   :  { %1588 = vmatprep.subr.bf16.mxu1 %v1860_v1 }
 0x16e   :  { %1711 = vmatpush3.bf16.msra.mxu0 %v1710_v31 }
 0x16f   :  { %1712 = vmatprep.subr.bf16.mxu0 %v1863_v12 }
 0x170   :  { %1589 = vmatpush3.bf16.msra.mxu1 %v1847_v3 }
 0x171   :  { %1590 = vmatprep.subr.bf16.mxu1 %v1860_v1 }
 0x172   :  { %1714 = vmatpush3.bf16.msra.mxu0 %v1713_v34 }
 0x173   :  { %1579 = vmatmul.mubr.bf16.gmra.mrb[20].mxu1 %v2104_v35  ;;  %1715 = vmatprep.subr.bf16.mxu0 %v1863_v12  ;;  %v912_v35 = vld [vmem:[%s2332_s4 + $0x70] sm:$0xff] }
 0x174   :  { %1591 = vmatpush3.bf16.msra.mxu1 %v1848_v4  ;;  %1598 = vmatprep.mubr.msk.bf16.mxu1 %vm1862_vm1, %v1860_v1  ;;  %v1716_v37 = vpack.c.bf16 %v913_v36, %v912_v35 }
 0x175   :  { %1592 = vmatprep.subr.bf16.mxu1 %v1860_v1 }
 0x176   :  { %1717 = vmatpush3.bf16.msra.mxu0 %v1716_v37 }
 0x177   :  { %1718 = vmatprep.subr.bf16.mxu0 %v1863_v12 }
 0x178   :  { %1593 = vmatpush3.bf16.msra.mxu1 %v1849_v5 }
 0x179   :  { %1594 = vmatprep.subr.bf16.mxu1 %v1860_v1 }
 0x17c   :  { %1595 = vmatpush3.bf16.msra.mxu1 %v1850_v6 }
 0x17d   :  { %1596 = vmatprep.subr.bf16.mxu1 %v1860_v1 }
 0x180   :  { %1597 = vmatpush3.bf16.msra.mxu1 %v1851_v7 }
 0x181   :  { %1721 = vmatprep.subr.bf16.mxu1 %v1863_v12 }
 0x183   :  { %1599 = vmatmul.mubr.bf16.vlgmr.msra.gmra.mrb[24].mxu1 %v2113_v46 }
 0x184   :  { %1602 = vmatprep.mubr.msk.bf16.mxu1 %vm1862_vm1, %v1860_v1  ;;  %1723 = vmatpush3.bf16.msra.mxu1 %v1695_v13 }
 0x185   :  { %1724 = vmatprep.subr.bf16.mxu1 %v1863_v12 }
 0x188   :  { %1726 = vmatpush3.bf16.msra.mxu1 %v1698_v18 }
 0x189   :  { %1727 = vmatprep.subr.bf16.mxu1 %v1863_v12 }
 0x18b   :  { %1603 = vmatmul.mubr.bf16.gmra.mrb[28].mxu1 %v2117_v47 }
 0x18c   :  { %1606 = vmatprep.mubr.msk.bf16.mxu1 %vm1862_vm1, %v1860_v1  ;;  %1729 = vmatpush3.bf16.msra.mxu1 %v1701_v22 }
 0x18d   :  { %1730 = vmatprep.subr.bf16.mxu1 %v1863_v12 }
 0x190   :  { %1732 = vmatpush3.bf16.msra.mxu1 %v1704_v25 }
 0x191   :  { %1733 = vmatprep.subr.bf16.mxu1 %v1863_v12 }
 0x193   :  { %1607 = vmatmul.mubr.bf16.gmra.mrb[32].mxu1 %v768_v41 }
 0x194   :  { %1684 = vmatprep.mubr.msk.f32.mxu1 %vm1862_vm1, %v1860_v1  ;;  %1735 = vmatpush3.bf16.msra.mxu1 %v1707_v28 }
 0x195   :  { %1736 = vmatprep.subr.bf16.mxu1 %v1863_v12 }
 0x198   :  { %1738 = vmatpush3.bf16.msra.mxu1 %v1710_v31 }
 0x199   :  { %1739 = vmatprep.subr.bf16.mxu1 %v1863_v12 }
 0x19c   :  { %1741 = vmatpush3.bf16.msra.mxu1 %v1713_v34 }
 0x19d   :  { %1742 = vmatprep.subr.bf16.mxu1 %v1863_v12 }
 0x1a0   :  { %1744 = vmatpush3.bf16.msra.mxu1 %v1716_v37 }
 0x216   :  { %v618_v38 = vpop.f32.mrb[0].mxu1 }
 0x217   :  { %v1544_v39 = vpop.f32.mrb[1].mxu1 }
 0x218   :  { %v621_v40 = vpop.f32.mrb[2].mxu1 }
 0x219   :  { %v1545_v41 = vpop.f32.mrb[3].mxu1 }
 0x21e   :  { %v626_v42 = vpop.f32.mrb[4].mxu1 }
 0x21f   :  { %v1548_v43 = vpop.f32.mrb[5].mxu1 }
 0x220   :  { %v629_v44 = vpop.f32.mrb[6].mxu1 }
 0x221   :  { %v1549_v45 = vpop.f32.mrb[7].mxu1 }
 0x226   :  { %v634_v46 = vpop.f32.mrb[8].mxu1 }
 0x227   :  { %v1552_v47 = vpop.f32.mrb[9].mxu1 }
 0x228   :  { %v637_v48 = vpop.f32.mrb[10].mxu1 }
 0x229   :  { %v1553_v49 = vpop.f32.mrb[11].mxu1 }
 0x236   :  { %v722_v50 = vpop.f32.mrb[12].mxu1 }
 0x237   :  { %v723_v51 = vadd.f32 %v722_v50, %v618_v38  ;;  %v1572_v52 = vpop.f32.mrb[13].mxu1 }
 0x238   :  { %v725_v53 = vpop.f32.mrb[14].mxu1 }
 0x239   :  { %v726_v54 = vadd.f32 %v725_v53, %v621_v40  ;;  %v1573_v55 = vpop.f32.mrb[15].mxu1 }
 0x23a   :  { %v988_v55 = vld [vmem:[%s2333_s5 + $0x8] sm:$0xff] }
 0x23e   :  { %v730_v56 = vpop.f32.mrb[16].mxu1 }
 0x23f   :  { %v731_v57 = vadd.f32 %v730_v56, %v626_v42  ;;  %v1576_v58 = vpop.f32.mrb[17].mxu1 }
 0x240   :  { %v733_v59 = vpop.f32.mrb[18].mxu1 }
 0x241   :  { %v734_v61 = vadd.f32 %v733_v59, %v629_v44  ;;  %v1577_v62 = vpop.f32.mrb[19].mxu1 }
 0x246   :  { %v738_v63 = vpop.f32.mrb[20].mxu1 }
 0x247   :  { %v739_v2 = vadd.f32 %v738_v63, %v634_v46  ;;  %v1580_v3 = vpop.f32.mrb[21].mxu1 }
 0x248   :  { %v741_v4 = vpop.f32.mrb[22].mxu1 }
 0x249   :  { %v1581_v5 = vpop.f32.mrb[23].mxu1 }
 0x256   :  { %v855_v6 = vpop.f32.mrb[24].mxu1 }
 0x257   :  { %v877_v7 = vadd.f32 %v855_v6, %v723_v51  ;;  %v1600_v9 = vpop.f32.mrb[25].mxu1 }
 0x258   :  { %v858_v11 = vpop.f32.mrb[26].mxu1 }
 0x259   :  { %v878_v13 = vadd.f32 %v858_v11, %v726_v54  ;;  %v1601_v15 = vpop.f32.mrb[27].mxu1  ;;  %v2274_v18 = vadd.f32 %v1428_v10, %v877_v7  ;;  %v987_v54 = vld [vmem:[%s2333_s5] sm:$0xff] }
 0x25a   :  { %v1719_v56 = vpack.c.bf16 %v988_v55, %v987_v54 }
 0x25b   :  { %v2276_v19 = vadd.f32 %v1428_v10, %v878_v13 }
 0x25d   :  { %v891_v21 = vadd.f32 %v2276_v19, %v2274_v18 }
 0x25e   :  { %v863_v22 = vpop.f32.mrb[28].mxu1 }
 0x25f   :  { %v892_v23 = vrot.slane %v891_v21, 4  ;;  %v879_v24 = vadd.f32 %v863_v22, %v731_v57  ;;  %v1604_v25 = vpop.f32.mrb[29].mxu1  ;;  %v884_v57 = vld [vmem:[%s2331_s3 + $0x4] sm:$0x1] }
 0x260   :  { %v866_v26 = vpop.f32.mrb[30].mxu1 }
 0x261   :  { %v893_v27 = vadd.f32 %v892_v23, %v891_v21  ;;  %v880_v28 = vadd.f32 %v866_v26, %v734_v61  ;;  %v1605_v29 = vpop.f32.mrb[31].mxu1  ;;  %v2282_v35 = vadd.f32 %v1428_v10, %v879_v24 }
 0x263   :  { %v894_v30 = vrot.slane %v893_v27, 2  ;;  %v2280_v32 = vadd.f32 %v1428_v10, %v880_v28  ;;  %v1094_v43 = vrot.slane %v2282_v35, 2 }
 0x265   :  { %v895_v31 = vadd.f32 %v894_v30, %v893_v27  ;;  %v1095_v40 = vrot.slane %v2280_v32, 2  ;;  %v1431_v27 = vld [vmem:[%s2331_s3 + $0x3] ss:$0 sm:$0xff] }
 0x266   :  { %v871_v33 = vpop.f32.mrb[32].mxu1 }
 0x267   :  { %v896_v34 = vrot.slane %v895_v31, 1  ;;  %v881_v36 = vadd.f32 %v871_v33, %v739_v2  ;;  %v1608_v37 = vpop.f32.mrb[33].mxu1  ;;  %v1096_v45 = vsel %vm1093_vm14, %v1094_v43, %v1095_v40 }
 0x268   :  { %v874_v38 = vpop.f32.mrb[34].mxu1 }
 0x269   :  { %v897_v39 = vadd.f32 %v896_v34, %v895_v31  ;;  %v2285_v41 = vadd.f32 %v1428_v10, %v881_v36  ;;  %v1609_v42 = vpop.f32.mrb[35].mxu1  ;;  %v1069_v10 = vlaneseq }
 0x26b   :  { %v1097_v44 = vrot.slane %v2285_v41, 2  ;;  %1643 = vmatmul.mubr.f32.vlgmr.msra.gmra.mrb[8].mxu0 %v897_v39  ;;  %v1070_v21 = vshrl.u32 %v1069_v10, 7 }
 0x26c   :  { %1649 = vmatprep.mubr.msk.f32.mxu0 %vm1862_vm1, %v1860_v1  ;;  %1720 = vmatpush3.bf16.msra.mxu0 %v1719_v56 }
 0x26d   :  { %v1098_v46 = vsel %vm1093_vm14, %v1095_v40, %v1097_v44  ;;  %1745 = vmatprep.subr.bf16.mxu0 %v1863_v12 }
 0x26e   :  { %v1101_v47 = vadd.f32 %v1098_v46, %v1096_v45 }
 0x270   :  { %v1102_v48 = vrot.slane %v1101_v47, 4 }
 0x272   :  { %v1103_v49 = vadd.f32 %v1102_v48, %v1101_v47 }
 0x274   :  { %v1104_v50 = vrot.slane %v1103_v49, 2 }
 0x276   :  { %v1105_v51 = vadd.f32 %v1104_v50, %v1103_v49 }
 0x278   :  { %v1106_v52 = vrot.slane %v1105_v51, 1 }
 0x27a   :  { %v1107_v53 = vadd.f32 %v1106_v52, %v1105_v51 }
 0x27c   :  { %1685 = vmatmul.mubr.f32.vlgmr.msra.gmra.mrb[36].mxu1 %v1107_v53 }
 0x33e   :  { %v980_v58 = vpop.f32.mrb[8].mxu0 }
 0x33f   :  { %vm984_vm15 = vcmp.ge.f32.partialorder %v980_v58, 0.0  ;;  %v985_v59 = vmul.f32 %v980_v58, %v884_v57  ;;  %v1644_v61 = vpop.f32.mrb[9].mxu0 }
 0x341   :  { %v986_v62 = vsel %vm984_vm15, %v980_v58, %v985_v59 }
 0x342   :  { %1650 = vmatmul.mubr.msk.f32.vlgmr.msra.gmra.mrb[10].mxu0 %vm989_vm0, %v986_v62 }
 0x343   :  { %1747 = vmatpush3.bf16.msra.mxu0 %v1719_v56  ;;  %1691 = vmatprep.mubr.msk.f32.mxu0 %vm1862_vm1, %v1860_v1  ;;  %v1071_v1 = vsub.s32 0, %v1070_v21 }
 0x34f   :  { %v1174_v63 = vpop.f32.mrb[36].mxu1 }
 0x350   :  { %vm1178_vm2 = vcmp.ge.f32.partialorder %v1174_v63, 0.0  ;;  %v1179_v2 = vmul.f32 %v1174_v63, %v884_v57  ;;  %v1686_v3 = vpop.f32.mrb[37].mxu1 }
 0x352   :  { %v1180_v12 = vsel %vm1178_vm2, %v1174_v63, %v1179_v2 }
 0x353   :  { %1692 = vmatmul.mubr.msk.f32.vlgmr.msra.gmra.mrb[12].mxu0 %vm989_vm0, %v1180_v12 }
 0x415   :  { %v1059_v4 = vpop.f32.mrb[10].mxu0 }
 0x416   :  { %v1430_v5 = vmul.f32 -1.442695, %v1059_v4  ;;  %v1651_v6 = vpop.f32.mrb[11].mxu0 }
 0x418   :  { %1852 = vpow2.f32 %v1430_v5 }
 0x422   :  { %v1853_v7 = vpop.eup %1852 }
 0x423   :  { %v1066_v9 = vadd.f32 1.0, %v1853_v7 }
 0x425   :  { %1854 = vrcp.f32 %v1066_v9 }
 0x426   :  { %v1250_v11 = vpop.f32.mrb[12].mxu0 }
 0x427   :  { %v1433_v13 = vmul.f32 -1.442695, %v1250_v11  ;;  %v1693_v15 = vpop.f32.mrb[13].mxu0 }
 0x429   :  { %1856 = vpow2.f32 %v1433_v13 }
 0x42f   :  { %v1855_v22 = vpop.eup %1854 }
 0x430   :  { %v1072_v23 = vrot.slane %v1855_v22, %v1071_v1 }
 0x432   :  { %v1073_v24 = vmul.f32 %v1072_v23, %v2274_v18  ;;  %v1074_v25 = vmul.f32 %v1072_v23, %v2276_v19 }
 0x433   :  { %v1857_v26 = vpop.eup %1856 }
 0x434   :  { %v1075_v28 = vadd.f32 %v1073_v24, %v2080_v60  ;;  %v1076_v29 = vadd.f32 %v1074_v25, %v2082_v0  ;;  %v1257_v30 = vadd.f32 1.0, %v1857_v26 }
 0x436   :  { %vm1077_vm1 = vcmp.ge.f32.partialorder %v1075_v28, 0.0  ;;  %vm1078_vm3 = vcmp.ge.f32.partialorder %v1076_v29, 0.0  ;;  %v1083_v31 = vmul.f32 %v1431_v27, %v1075_v28  ;;  %v1084_v33 = vmul.f32 %v1431_v27, %v1076_v29 }
 0x437   :  { %1858 = vrcp.f32 %v1257_v30 }
 0x438   :  { %v1085_v34 = vsel %vm1077_vm1, %v1075_v28, %v1083_v31  ;;  %v1086_v36 = vsel %vm1078_vm3, %v1076_v29, %v1084_v33 }
 0x439   :  { %v1445_v18 = vpack.c.bf16 %v1086_v36, %v1085_v34 }
 0x43b   :  { %1446 = vst [vmem:[%s2334_s6] sm:$0xff] %v1445_v18  }
 0x441   :  { %v1859_v19 = vpop.eup %1858 }
 0x442   :  { %v1263_v37 = vrot.slane %v1859_v19, %v1071_v1 }
 0x444   :  { %v1264_v38 = vmul.f32 %v1263_v37, %v2282_v35  ;;  %v1265_v60 = vmul.f32 %v1263_v37, %v2280_v32  ;;  %v1266_v0 = vmul.f32 %v1263_v37, %v2285_v41 }
 0x446   :  { %v1276_v39 = vadd.f32 %v1270_v16, %v1264_v38  ;;  %v1277_v40 = vadd.f32 %v2095_v20, %v1265_v60  ;;  %v1278_v42 = vadd.f32 %v1271_v17, %v1266_v0 }
 0x448   :  { %vm1279_vm4 = vcmp.ge.f32.partialorder %v1276_v39, 0.0  ;;  %vm1280_vm5 = vcmp.ge.f32.partialorder %v1277_v40, 0.0  ;;  %vm1281_vm6 = vcmp.ge.f32.partialorder %v1278_v42, 0.0  ;;  %v1282_v43 = vmul.f32 %v1431_v27, %v1276_v39 }
 0x449   :  { %v1283_v44 = vmul.f32 %v1431_v27, %v1277_v40  ;;  %v1284_v45 = vmul.f32 %v1431_v27, %v1278_v42 }
 0x44a   :  { %v1285_v46 = vsel %vm1279_vm4, %v1276_v39, %v1282_v43 }
 0x44b   :  { %v1286_v35 = vsel %vm1280_vm5, %v1277_v40, %v1283_v44  ;;  %v1287_v47 = vsel %vm1281_vm6, %v1278_v42, %v1284_v45  ;;  %v1291_v32 = vrot.slane %v1285_v46, 2 }
 0x44c   :  { %v1292_v48 = vrot.slane %v1286_v35, 2  ;;  %v1294_v41 = vrot.slane %v1287_v47, 2 }
 0x44e   :  { %v1293_v8 = vsel %vm1093_vm14, %v1291_v32, %v1292_v48  ;;  %v1295_v16 = vsel %vm1093_vm14, %v1292_v48, %v1294_v41 }
 0x44f   :  { %v1450_v20 = vpack.c.bf16 %v1295_v16, %v1293_v8 }
 0x451   :  { %1452 = vst [vmem:[%s2334_s6 + $0x8] sm:$0xff] %v1450_v20  }

</bundles_post_ra>
